<compile_context>
chip_gen: v7x
topology: tpu7x:2x2x1
jax: 0.10.0
libtpu: 0.0.40
codegen_flags: <defaults>
</compile_context>

<pallas_src>
import jax
import jax.numpy as jnp
from jax.experimental import pallas as pl
from jax.experimental.pallas import tpu as pltpu


_TARGET_TILE_BYTES = 4 * 1024 * 1024          # ~4 MiB per tile
_LANE_CANDIDATES = (2048, 1024, 512, 256, 128)  # lane-dense widths (mult. of 128)


def _identity_kernel(x_ref, o_ref):
    # Elementwise copy of the current VMEM tile.
    o_ref[...] = x_ref[...]


def _pick_cols(total):
    """Largest lane-dense width (multiple of 128) that divides `total`."""
    for c in _LANE_CANDIDATES:
        if total % c == 0:
            return c
    return None


def _copy_2d(x2d):
    rows, cols = x2d.shape
    itemsize = jnp.dtype(x2d.dtype).itemsize

    # Row tile sized for ~4 MiB, multiple of 8 sublanes; clamp to full extent
    # when the array is smaller than one tile.
    tile_r = max(8, 8 * ((_TARGET_TILE_BYTES // (cols * itemsize)) // 8))
    if tile_r >= rows:
        tile_r = rows

    grid = (pl.cdiv(rows, tile_r),)
    return pl.pallas_call(
        _identity_kernel,
        out_shape=jax.ShapeDtypeStruct((rows, cols), x2d.dtype),
        grid=grid,
        in_specs=[pl.BlockSpec((tile_r, cols), lambda i: (i, 0))],
        out_specs=pl.BlockSpec((tile_r, cols), lambda i: (i, 0)),
        # Output buffer IS the input buffer: no extra HBM allocation.
        input_output_aliases={0: 0},
        compiler_params=pltpu.CompilerParams(
            dimension_semantics=("parallel",),
        ),
    )(x2d)


@jax.jit
def identity_pallas(x):
    """Identity forward pass implemented as a tiled Pallas TPU copy kernel."""
    if x.size == 0:
        # Nothing to copy; avoids an invalid reshape on zero-element arrays.
        return x

    orig_shape = x.shape
    total = x.size

    flat = x.reshape(-1)
    cols = _pick_cols(total)
    if cols is None:
        # Ragged total: pad the flat view up to a multiple of 128 lanes so the
        # copy still uses full vregs / unmasked stores; strip the pad after.
        pad = (-total) % 128
        flat = jnp.pad(flat, (0, pad))
        cols = _pick_cols(total + pad)

    rows = flat.shape[0] // cols
    out = _copy_2d(flat.reshape(rows, cols)).reshape(-1)
    if out.shape[0] != total:
        out = out[:total]
    return out.reshape(orig_shape)


if __name__ == "__main__":
    key = jax.random.PRNGKey(0)
    # Small NCHW-style input consistent with how Identity is used in SimCLR
    # (as a replacement for a classifier head / fc layer).
    x = jax.random.normal(key, (2, 4, 16, 16), dtype=jnp.float32)

    y = identity_pallas(x)
    jax.block_until_ready(y)

    assert y.shape == x.shape and y.dtype == x.dtype
    assert bool(jnp.array_equal(y, x))
    print("KERNEL_OK")
</pallas_src>

<mosaic_0001>
module attributes {stable_mosaic.version = 11 : i64} {
  func.func @_identity_kernel(%arg0: i32, %arg1: memref<1x2048xf32, #tpu.memory_space<vmem>>, %arg2: memref<1x2048xf32, #tpu.memory_space<vmem>>) attributes {dimension_semantics = [#tpu.dimension_semantics<parallel>], iteration_bounds = array<i64: 1>, scalar_prefetch = 0 : i64, scratch_operands = 0 : i64, tpu.core_type = #tpu.core_type<tc>, window_params = [{transform_indices = @transform_0, window_bounds = array<i64: 1, 2048>}, {transform_indices = @transform_1, window_bounds = array<i64: 1, 2048>}]} {
    %c0 = arith.constant 0 : index
    %c0_0 = arith.constant 0 : index
    %0 = vector.load %arg1[%c0, %c0_0] : memref<1x2048xf32, #tpu.memory_space<vmem>>, vector<1x2048xf32>
    %c0_1 = arith.constant 0 : index
    %c0_2 = arith.constant 0 : index
    %1 = vector.load %arg2[%c0_1, %c0_2] : memref<1x2048xf32, #tpu.memory_space<vmem>>, vector<1x2048xf32>
    tpu.vector_store %arg2[%c0_1, %c0_2], %0 {strides = array<i32>} : memref<1x2048xf32, #tpu.memory_space<vmem>>, vector<1x2048xf32>,
    return
  }
  func.func @transform_0(%arg0: i32) -> (i32, i32) {
    %c0_i32 = arith.constant 0 : i32
    %c0_i32_0 = arith.constant 0 : i32
    return %arg0, %c0_i32 : i32, i32
  }
  func.func @transform_1(%arg0: i32) -> (i32, i32) {
    %c0_i32 = arith.constant 0 : i32
    %c0_i32_0 = arith.constant 0 : i32
    return %arg0, %c0_i32 : i32, i32
  }
}

</mosaic_0001>

<bundles_post_ra>
// kernel: identity_pallas.1
= control target key start
LH: loop header
LB: loop body
LE: loop exit
PB: predicated region body
PF: predicated region fallthrough
CT: control target
= control target key end

     0   :  { %s38_s0 = inlined_call_operand.vmem [shape: f32[1,2048], index: 0, kind: input, shape index: {}, may-alias: {0,1}]   ;;  %s39_s1 = inlined_call_operand.vmem [shape: f32[1,2048], index: 1, kind: output, shape index: {}, may-alias: {0,1}]  }
   0x1   :  { %v8_v0 = vld [vmem:[%s38_s0] sm:$0xff]  ;;  %v9_v1 = vld [vmem:[%s38_s0 + $0x8] sm:$0xff] }
   0x2   :  { %10 = vst [vmem:[%s39_s1] sm:$0xff] %v8_v0  ;;  %11 = vst [vmem:[%s39_s1 + $0x8] sm:$0xff] %v9_v1 }

</bundles_post_ra>
